<compile_context>
chip_gen: v6e
topology: v6e:2x2x1
jax: 0.10.0
libtpu: 0.0.40
codegen_flags: <defaults>
</compile_context>

<pallas_src>
import functools

import jax
import jax.numpy as jnp
from jax import lax
from jax.experimental import pallas as pl
from jax.experimental.pallas import tpu as pltpu

BN_EPS = 1e-5
ACT_THRES = 6.0


def _round_up(a, b):
    return pl.cdiv(a, b) * b


def _make_conv_stats_kernel(cin, kh, kw, img_w, tile_m):
    """Pass 1: conv on a tile of the flattened pixel grid + per-channel sum/sumsq."""

    def kernel(w_ref, xm_ref, xh_ref, mask_ref, y_ref, ps1_ref, ps2_ref):
        # x tile plus halo: (Cin, tile_m + halo), bf16.
        xw = jnp.concatenate([xm_ref[...], xh_ref[...]], axis=-1)
        acc = None
        # Conv = kh*kw shifted matmuls; im2col columns are built implicitly via
        # static lane-offset slices of the raw input tile (no (K, M) matrix in HBM).
        for i in range(kh):
            for j in range(kw):
                t = i * kw + j
                w_tap = w_ref[:, t * cin:(t + 1) * cin]                  # (Cout, Cin) bf16
                x_tap = xw[:, i * img_w + j:i * img_w + j + tile_m]      # (Cin, tile_m) bf16
                part = jnp.dot(w_tap, x_tap, preferred_element_type=jnp.float32)
                acc = part if acc is None else acc + part
        y_ref[...] = acc                                                 # (Cout, tile_m) f32

        # Per-channel partial statistics over *valid* output positions only,
        # kept in f32 (single-pass sum / sum-of-squares; var clamped >= 0 later).
        mask = mask_ref[...]                                             # (1, tile_m) f32 {0,1}
        ym = acc * mask
        ps1_ref[0] = jnp.sum(ym, axis=1, keepdims=True)                  # sum(y)
        ps2_ref[0] = jnp.sum(ym * acc, axis=1, keepdims=True)            # sum(y^2)

    return kernel


def _make_bn_act_kernel(ho, wo, act_thres):
    """Pass 2: y * scale + bias -> clip[0, act_thres], emitted as NCHW."""

    def kernel(scale_ref, bias_ref, y_ref, o_ref):
        y = y_ref[...][:, 0, :, :]                        # (Cout, H, W) f32
        z = y * scale_ref[...] + bias_ref[...]            # (Cout, 1, 1) broadcast
        o_ref[0] = jnp.clip(z[:, :ho, :wo], 0.0, act_thres)

    return kernel


@functools.partial(jax.jit, static_argnames=("kernel_size", "tile_m"))
def conv_block_forward(x, weight, kernel_size=3, tile_m=512):
    """x: (N, Cin, H, W); weight: (Cout, Cin, kh, kw). Returns (N, Cout, Ho, Wo) f32."""
    n, cin, h, w = x.shape
    cout = weight.shape[0]
    kh = kw = kernel_size
    ho, wo = h - kh + 1, w - kw + 1
    k = cin * kh * kw

    m_grid = n * h * w                 # flattened input-grid positions (conv computed here)
    m_valid = n * ho * wo              # valid conv outputs (BN statistics population)

    # Halo on the lane axis so every tap (i, j) of a tile is a static in-tile slice.
    halo = max(128, _round_up((kh - 1) * w + (kw - 1), 128))
    tile = max(halo, min(_round_up(tile_m, halo), _round_up(m_grid, halo)))
    m_pad = _round_up(m_grid, tile)
    n_tiles = m_pad // tile

    # Input as (Cin, N*H*W) bf16, zero-padded by `halo` lanes on the right.
    x2 = jnp.transpose(x.astype(jnp.bfloat16), (1, 0, 2, 3)).reshape(cin, m_grid)
    x2 = jnp.pad(x2, ((0, 0), (0, m_pad + halo - m_grid)))

    # Flattened weight in tap-major order (i, j, c) to match the in-kernel tap loop.
    wf = jnp.transpose(weight.astype(jnp.bfloat16), (0, 2, 3, 1)).reshape(cout, k)

    # Validity mask over the flattened grid (drops ho >= Ho, wo >= Wo and pad lanes).
    pos = jnp.arange(m_pad, dtype=jnp.int32)
    pix = pos % (h * w)
    valid = (pos < m_grid) & (pix // w <= h - kh) & (pix % w <= w - kw)
    mask = valid.astype(jnp.float32).reshape(1, m_pad)

    conv_stats = _make_conv_stats_kernel(cin, kh, kw, w, tile)
    y, ps1, ps2 = pl.pallas_call(
        conv_stats,
        grid=(n_tiles,),
        out_shape=(
            jax.ShapeDtypeStruct((cout, m_pad), jnp.float32),
            jax.ShapeDtypeStruct((n_tiles, cout, 1), jnp.float32),
            jax.ShapeDtypeStruct((n_tiles, cout, 1), jnp.float32),
        ),
        in_specs=[
            pl.BlockSpec((cout, k), lambda m: (0, 0)),                            # weights (resident)
            pl.BlockSpec((cin, tile), lambda m: (0, m)),                          # x main tile
            pl.BlockSpec((cin, halo), lambda m: (0, (m + 1) * (tile // halo))),   # x halo
            pl.BlockSpec((1, tile), lambda m: (0, m)),                            # validity mask
        ],
        out_specs=(
            pl.BlockSpec((cout, tile), lambda m: (0, m)),
            pl.BlockSpec((1, cout, 1), lambda m: (m, 0, 0)),
            pl.BlockSpec((1, cout, 1), lambda m: (m, 0, 0)),
        ),
        compiler_params=pltpu.CompilerParams(
            dimension_semantics=("parallel",),
            vmem_limit_bytes=32 * 1024 * 1024,
        ),
    )(wf, x2, x2, mask)

    # Tiny per-channel scalar math in f32 (biased variance, matching BatchNorm2d).
    s1 = jnp.sum(ps1, axis=0)[:, 0]
    s2 = jnp.sum(ps2, axis=0)[:, 0]
    mean = s1 / m_valid
    var = jnp.maximum(s2 / m_valid - mean * mean, 0.0)
    scale = lax.rsqrt(var + BN_EPS)
    bias = -mean * scale
    scale3 = scale.reshape(cout, 1, 1)
    bias3 = bias.reshape(cout, 1, 1)

    # Pass 2: normalize + ReLU6 and emit NCHW directly (valid window only).
    y4 = y[:, :m_grid].reshape(cout, n, h, w)
    bn_act = _make_bn_act_kernel(ho, wo, ACT_THRES)
    out = pl.pallas_call(
        bn_act,
        grid=(n,),
        out_shape=jax.ShapeDtypeStruct((n, cout, ho, wo), jnp.float32),
        in_specs=[
            pl.BlockSpec((cout, 1, 1), lambda b: (0, 0, 0)),
            pl.BlockSpec((cout, 1, 1), lambda b: (0, 0, 0)),
            pl.BlockSpec((cout, 1, h, w), lambda b: (0, b, 0, 0)),
        ],
        out_specs=pl.BlockSpec((1, cout, ho, wo), lambda b: (b, 0, 0, 0)),
        compiler_params=pltpu.CompilerParams(
            dimension_semantics=("parallel",),
            vmem_limit_bytes=32 * 1024 * 1024,
        ),
    )(scale3, bias3, y4)
    return out


def _reference(x, weight):
    """Pure-JAX reference (same bf16 operand quantization as the kernel path)."""
    xq = x.astype(jnp.bfloat16).astype(jnp.float32)
    wq = weight.astype(jnp.bfloat16).astype(jnp.float32)
    y = lax.conv_general_dilated(
        xq, wq, window_strides=(1, 1), padding="VALID",
        dimension_numbers=("NCHW", "OIHW", "NCHW"))
    mean = jnp.mean(y, axis=(0, 2, 3), keepdims=True)
    var = jnp.mean((y - mean) ** 2, axis=(0, 2, 3), keepdims=True)
    y = (y - mean) * lax.rsqrt(var + BN_EPS)
    return jnp.clip(y, 0.0, ACT_THRES)


if __name__ == "__main__":
    # Small shapes consistent with ConvBlock(in_channels=4, out_channels=8, kernel_size=3).
    N, CIN, H, W = 2, 4, 16, 16
    COUT, KS = 8, 3

    key = jax.random.PRNGKey(0)
    kx, kw_ = jax.random.split(key)
    x = jax.random.normal(kx, (N, CIN, H, W), dtype=jnp.float32)
    fan_in = CIN * KS * KS
    weight = jax.random.normal(kw_, (COUT, CIN, KS, KS), dtype=jnp.float32) * (2.0 / fan_in) ** 0.5

    # Small tile so the tiny demo actually exercises the multi-tile grid and the
    # partial-statistics reduction; real shapes should use the 512+ default.
    out = conv_block_forward(x, weight, kernel_size=KS, tile_m=128)
    out = jax.block_until_ready(out)

    ref = _reference(x, weight)
    assert out.shape == (N, COUT, H - KS + 1, W - KS + 1), out.shape
    err = float(jnp.max(jnp.abs(out - ref)))
    assert jnp.allclose(out, ref, atol=2e-4, rtol=2e-4), err

    print("KERNEL_OK")
</pallas_src>

<mosaic_0001>
module attributes {stable_mosaic.version = 11 : i64} {
  func.func @kernel(%arg0: i32, %arg1: memref<8x36xbf16, #tpu.memory_space<vmem>>, %arg2: memref<4x128xbf16, #tpu.memory_space<vmem>>, %arg3: memref<4x128xbf16, #tpu.memory_space<vmem>>, %arg4: memref<1x128xf32, #tpu.memory_space<vmem>>, %arg5: memref<8x128xf32, #tpu.memory_space<vmem>>, %arg6: memref<1x8x1xf32, #tpu.memory_space<vmem>>, %arg7: memref<1x8x1xf32, #tpu.memory_space<vmem>>) attributes {dimension_semantics = [#tpu.dimension_semantics<parallel>], iteration_bounds = array<i64: 4>, scalar_prefetch = 0 : i64, scratch_operands = 0 : i64, tpu.core_type = #tpu.core_type<tc>, window_params = [{pipeline_mode = #tpu.pipeline_mode<synchronous>, transform_indices = @transform_0, window_bounds = array<i64: 8, 36>}, {transform_indices = @transform_1, window_bounds = array<i64: 4, 128>}, {transform_indices = @transform_2, window_bounds = array<i64: 4, 128>}, {transform_indices = @transform_3, window_bounds = array<i64: 1, 128>}, {transform_indices = @transform_4, window_bounds = array<i64: 8, 128>}, {transform_indices = @transform_5, window_bounds = array<i64: 1, 8, 1>}, {transform_indices = @transform_6, window_bounds = array<i64: 1, 8, 1>}]} {
    %c0 = arith.constant 0 : index
    %c0_0 = arith.constant 0 : index
    %0 = vector.load %arg2[%c0, %c0_0] : memref<4x128xbf16, #tpu.memory_space<vmem>>, vector<4x128xbf16>
    %c0_1 = arith.constant 0 : index
    %c0_2 = arith.constant 0 : index
    %1 = vector.load %arg3[%c0_1, %c0_2] : memref<4x128xbf16, #tpu.memory_space<vmem>>, vector<4x128xbf16>
    %2 = tpu.concatenate %0, %1 in 1 : vector<4x128xbf16>, vector<4x128xbf16> -> vector<4x256xbf16>
    %c0_3 = arith.constant 0 : index
    %c0_4 = arith.constant 0 : index
    %3 = vector.load %arg1[%c0_3, %c0_4] : memref<8x36xbf16, #tpu.memory_space<vmem>>, vector<8x4xbf16>
    %4 = vector.extract_strided_slice %2 {offsets = [0, 0], sizes = [4, 128], strides = [1, 1]} : vector<4x256xbf16> to vector<4x128xbf16>
    %cst = arith.constant dense<0.000000e+00> : vector<8x128xf32>
    %5 = tpu.matmul %3, %4, %cst {dimension_numbers = #tpu.dot_dimension_numbers<[1], [0], [0], [1], [0, 0, 1, 1], [], []>} : vector<8x4xbf16>, vector<4x128xbf16>, vector<8x128xf32> -> vector<8x128xf32>
    %c0_5 = arith.constant 0 : index
    %c4 = arith.constant 4 : index
    %6 = vector.load %arg1[%c0_5, %c4] : memref<8x36xbf16, #tpu.memory_space<vmem>>, vector<8x4xbf16>
    %7 = vector.extract_strided_slice %2 {offsets = [0, 1], sizes = [4, 128], strides = [1, 1]} : vector<4x256xbf16> to vector<4x128xbf16>
    %cst_6 = arith.constant dense<0.000000e+00> : vector<8x128xf32>
    %8 = tpu.matmul %6, %7, %cst_6 {dimension_numbers = #tpu.dot_dimension_numbers<[1], [0], [0], [1], [0, 0, 1, 1], [], []>} : vector<8x4xbf16>, vector<4x128xbf16>, vector<8x128xf32> -> vector<8x128xf32>
    %9 = arith.addf %5, %8 : vector<8x128xf32>
    %c0_7 = arith.constant 0 : index
    %c8 = arith.constant 8 : index
    %10 = vector.load %arg1[%c0_7, %c8] : memref<8x36xbf16, #tpu.memory_space<vmem>>, vector<8x4xbf16>
    %11 = vector.extract_strided_slice %2 {offsets = [0, 2], sizes = [4, 128], strides = [1, 1]} : vector<4x256xbf16> to vector<4x128xbf16>
    %cst_8 = arith.constant dense<0.000000e+00> : vector<8x128xf32>
    %12 = tpu.matmul %10, %11, %cst_8 {dimension_numbers = #tpu.dot_dimension_numbers<[1], [0], [0], [1], [0, 0, 1, 1], [], []>} : vector<8x4xbf16>, vector<4x128xbf16>, vector<8x128xf32> -> vector<8x128xf32>
    %13 = arith.addf %9, %12 : vector<8x128xf32>
    %c0_9 = arith.constant 0 : index
    %c12 = arith.constant 12 : index
    %14 = vector.load %arg1[%c0_9, %c12] : memref<8x36xbf16, #tpu.memory_space<vmem>>, vector<8x4xbf16>
    %15 = vector.extract_strided_slice %2 {offsets = [0, 16], sizes = [4, 128], strides = [1, 1]} : vector<4x256xbf16> to vector<4x128xbf16>
    %cst_10 = arith.constant dense<0.000000e+00> : vector<8x128xf32>
    %16 = tpu.matmul %14, %15, %cst_10 {dimension_numbers = #tpu.dot_dimension_numbers<[1], [0], [0], [1], [0, 0, 1, 1], [], []>} : vector<8x4xbf16>, vector<4x128xbf16>, vector<8x128xf32> -> vector<8x128xf32>
    %17 = arith.addf %13, %16 : vector<8x128xf32>
    %c0_11 = arith.constant 0 : index
    %c16 = arith.constant 16 : index
    %18 = vector.load %arg1[%c0_11, %c16] : memref<8x36xbf16, #tpu.memory_space<vmem>>, vector<8x4xbf16>
    %19 = vector.extract_strided_slice %2 {offsets = [0, 17], sizes = [4, 128], strides = [1, 1]} : vector<4x256xbf16> to vector<4x128xbf16>
    %cst_12 = arith.constant dense<0.000000e+00> : vector<8x128xf32>
    %20 = tpu.matmul %18, %19, %cst_12 {dimension_numbers = #tpu.dot_dimension_numbers<[1], [0], [0], [1], [0, 0, 1, 1], [], []>} : vector<8x4xbf16>, vector<4x128xbf16>, vector<8x128xf32> -> vector<8x128xf32>
    %21 = arith.addf %17, %20 : vector<8x128xf32>
    %c0_13 = arith.constant 0 : index
    %c20 = arith.constant 20 : index
    %22 = vector.load %arg1[%c0_13, %c20] : memref<8x36xbf16, #tpu.memory_space<vmem>>, vector<8x4xbf16>
    %23 = vector.extract_strided_slice %2 {offsets = [0, 18], sizes = [4, 128], strides = [1, 1]} : vector<4x256xbf16> to vector<4x128xbf16>
    %cst_14 = arith.constant dense<0.000000e+00> : vector<8x128xf32>
    %24 = tpu.matmul %22, %23, %cst_14 {dimension_numbers = #tpu.dot_dimension_numbers<[1], [0], [0], [1], [0, 0, 1, 1], [], []>} : vector<8x4xbf16>, vector<4x128xbf16>, vector<8x128xf32> -> vector<8x128xf32>
    %25 = arith.addf %21, %24 : vector<8x128xf32>
    %c0_15 = arith.constant 0 : index
    %c24 = arith.constant 24 : index
    %26 = vector.load %arg1[%c0_15, %c24] : memref<8x36xbf16, #tpu.memory_space<vmem>>, vector<8x4xbf16>
    %27 = vector.extract_strided_slice %2 {offsets = [0, 32], sizes = [4, 128], strides = [1, 1]} : vector<4x256xbf16> to vector<4x128xbf16>
    %cst_16 = arith.constant dense<0.000000e+00> : vector<8x128xf32>
    %28 = tpu.matmul %26, %27, %cst_16 {dimension_numbers = #tpu.dot_dimension_numbers<[1], [0], [0], [1], [0, 0, 1, 1], [], []>} : vector<8x4xbf16>, vector<4x128xbf16>, vector<8x128xf32> -> vector<8x128xf32>
    %29 = arith.addf %25, %28 : vector<8x128xf32>
    %c0_17 = arith.constant 0 : index
    %c28 = arith.constant 28 : index
    %30 = vector.load %arg1[%c0_17, %c28] : memref<8x36xbf16, #tpu.memory_space<vmem>>, vector<8x4xbf16>
    %31 = vector.extract_strided_slice %2 {offsets = [0, 33], sizes = [4, 128], strides = [1, 1]} : vector<4x256xbf16> to vector<4x128xbf16>
    %cst_18 = arith.constant dense<0.000000e+00> : vector<8x128xf32>
    %32 = tpu.matmul %30, %31, %cst_18 {dimension_numbers = #tpu.dot_dimension_numbers<[1], [0], [0], [1], [0, 0, 1, 1], [], []>} : vector<8x4xbf16>, vector<4x128xbf16>, vector<8x128xf32> -> vector<8x128xf32>
    %33 = arith.addf %29, %32 : vector<8x128xf32>
    %c0_19 = arith.constant 0 : index
    %c32 = arith.constant 32 : index
    %34 = vector.load %arg1[%c0_19, %c32] : memref<8x36xbf16, #tpu.memory_space<vmem>>, vector<8x4xbf16>
    %35 = vector.extract_strided_slice %2 {offsets = [0, 34], sizes = [4, 128], strides = [1, 1]} : vector<4x256xbf16> to vector<4x128xbf16>
    %cst_20 = arith.constant dense<0.000000e+00> : vector<8x128xf32>
    %36 = tpu.matmul %34, %35, %cst_20 {dimension_numbers = #tpu.dot_dimension_numbers<[1], [0], [0], [1], [0, 0, 1, 1], [], []>} : vector<8x4xbf16>, vector<4x128xbf16>, vector<8x128xf32> -> vector<8x128xf32>
    %37 = arith.addf %33, %36 : vector<8x128xf32>
    %c0_21 = arith.constant 0 : index
    %c0_22 = arith.constant 0 : index
    %38 = vector.load %arg5[%c0_21, %c0_22] : memref<8x128xf32, #tpu.memory_space<vmem>>, vector<8x128xf32>
    tpu.vector_store %arg5[%c0_21, %c0_22], %37 {strides = array<i32>} : memref<8x128xf32, #tpu.memory_space<vmem>>, vector<8x128xf32>,
    %c0_23 = arith.constant 0 : index
    %c0_24 = arith.constant 0 : index
    %39 = vector.load %arg4[%c0_23, %c0_24] : memref<1x128xf32, #tpu.memory_space<vmem>>, vector<1x128xf32>
    %40 = vector.broadcast %39 : vector<1x128xf32> to vector<8x128xf32>
    %41 = arith.mulf %37, %40 : vector<8x128xf32>
    %cst_25 = arith.constant dense<0.000000e+00> : vector<8xf32>
    %42 = vector.multi_reduction <add>, %41, %cst_25 [1] : vector<8x128xf32> to vector<8xf32>
    %43 = vector.shape_cast %42 : vector<8xf32> to vector<8x1xf32>
    %c0_26 = arith.constant 0 : index
    %c0_27 = arith.constant 0 : index
    %c0_28 = arith.constant 0 : index
    %44 = vector.load %arg6[%c0_26, %c0_27, %c0_28] : memref<1x8x1xf32, #tpu.memory_space<vmem>>, vector<1x8x1xf32>
    %45 = vector.shape_cast %44 : vector<1x8x1xf32> to vector<8x1xf32>
    %46 = vector.shape_cast %43 : vector<8x1xf32> to vector<1x8x1xf32>
    tpu.vector_store %arg6[%c0_26, %c0_27, %c0_28], %46 {strides = array<i32>} : memref<1x8x1xf32, #tpu.memory_space<vmem>>, vector<1x8x1xf32>,
    %47 = arith.mulf %41, %37 : vector<8x128xf32>
    %cst_29 = arith.constant dense<0.000000e+00> : vector<8xf32>
    %48 = vector.multi_reduction <add>, %47, %cst_29 [1] : vector<8x128xf32> to vector<8xf32>
    %49 = vector.shape_cast %48 : vector<8xf32> to vector<8x1xf32>
    %c0_30 = arith.constant 0 : index
    %c0_31 = arith.constant 0 : index
    %c0_32 = arith.constant 0 : index
    %50 = vector.load %arg7[%c0_30, %c0_31, %c0_32] : memref<1x8x1xf32, #tpu.memory_space<vmem>>, vector<1x8x1xf32>
    %51 = vector.shape_cast %50 : vector<1x8x1xf32> to vector<8x1xf32>
    %52 = vector.shape_cast %49 : vector<8x1xf32> to vector<1x8x1xf32>
    tpu.vector_store %arg7[%c0_30, %c0_31, %c0_32], %52 {strides = array<i32>} : memref<1x8x1xf32, #tpu.memory_space<vmem>>, vector<1x8x1xf32>,
    return
  }
  func.func @transform_0(%arg0: i32) -> (i32, i32) {
    %c0_i32 = arith.constant 0 : i32
    %c0_i32_0 = arith.constant 0 : i32
    %c0_i32_1 = arith.constant 0 : i32
    return %c0_i32, %c0_i32_0 : i32, i32
  }
  func.func @transform_1(%arg0: i32) -> (i32, i32) {
    %c0_i32 = arith.constant 0 : i32
    %c0_i32_0 = arith.constant 0 : i32
    return %c0_i32, %arg0 : i32, i32
  }
  func.func @transform_2(%arg0: i32) -> (i32, i32) {
    %c1_i32 = arith.constant 1 : i32
    %0 = arith.addi %arg0, %c1_i32 : i32
    %c1_i32_0 = arith.constant 1 : i32
    %1 = arith.muli %0, %c1_i32_0 : i32
    %c0_i32 = arith.constant 0 : i32
    %c0_i32_1 = arith.constant 0 : i32
    return %c0_i32, %1 : i32, i32
  }
  func.func @transform_3(%arg0: i32) -> (i32, i32) {
    %c0_i32 = arith.constant 0 : i32
    %c0_i32_0 = arith.constant 0 : i32
    return %c0_i32, %arg0 : i32, i32
  }
  func.func @transform_4(%arg0: i32) -> (i32, i32) {
    %c0_i32 = arith.constant 0 : i32
    %c0_i32_0 = arith.constant 0 : i32
    return %c0_i32, %arg0 : i32, i32
  }
  func.func @transform_5(%arg0: i32) -> (i32, i32, i32) {
    %c0_i32 = arith.constant 0 : i32
    %c0_i32_0 = arith.constant 0 : i32
    %c0_i32_1 = arith.constant 0 : i32
    return %arg0, %c0_i32, %c0_i32_0 : i32, i32, i32
  }
  func.func @transform_6(%arg0: i32) -> (i32, i32, i32) {
    %c0_i32 = arith.constant 0 : i32
    %c0_i32_0 = arith.constant 0 : i32
    %c0_i32_1 = arith.constant 0 : i32
    return %arg0, %c0_i32, %c0_i32_0 : i32, i32, i32
  }
}

module attributes {stable_mosaic.version = 11 : i64} {
  func.func @kernel(%arg0: i32, %arg1: memref<8x1x1xf32, #tpu.memory_space<vmem>>, %arg2: memref<8x1x1xf32, #tpu.memory_space<vmem>>, %arg3: memref<8x1x16x16xf32, #tpu.memory_space<vmem>>, %arg4: memref<1x8x14x14xf32, #tpu.memory_space<vmem>>) attributes {dimension_semantics = [#tpu.dimension_semantics<parallel>], iteration_bounds = array<i64: 2>, scalar_prefetch = 0 : i64, scratch_operands = 0 : i64, tpu.core_type = #tpu.core_type<tc>, window_params = [{pipeline_mode = #tpu.pipeline_mode<synchronous>, transform_indices = @transform_0, window_bounds = array<i64: 8, 1, 1>}, {pipeline_mode = #tpu.pipeline_mode<synchronous>, transform_indices = @transform_1, window_bounds = array<i64: 8, 1, 1>}, {transform_indices = @transform_2, window_bounds = array<i64: 8, 1, 16, 16>}, {transform_indices = @transform_3, window_bounds = array<i64: 1, 8, 14, 14>}]} {
    %c0 = arith.constant 0 : index
    %c0_0 = arith.constant 0 : index
    %c0_1 = arith.constant 0 : index
    %c0_2 = arith.constant 0 : index
    %0 = vector.load %arg3[%c0, %c0_0, %c0_1, %c0_2] : memref<8x1x16x16xf32, #tpu.memory_space<vmem>>, vector<8x1x16x16xf32>
    %1 = vector.shape_cast %0 : vector<8x1x16x16xf32> to vector<8x16x16xf32>
    %c0_3 = arith.constant 0 : index
    %c0_4 = arith.constant 0 : index
    %c0_5 = arith.constant 0 : index
    %2 = vector.load %arg1[%c0_3, %c0_4, %c0_5] : memref<8x1x1xf32, #tpu.memory_space<vmem>>, vector<8x1x1xf32>
    %3 = vector.broadcast %2 : vector<8x1x1xf32> to vector<8x16x16xf32>
    %4 = arith.mulf %1, %3 : vector<8x16x16xf32>
    %c0_6 = arith.constant 0 : index
    %c0_7 = arith.constant 0 : index
    %c0_8 = arith.constant 0 : index
    %5 = vector.load %arg2[%c0_6, %c0_7, %c0_8] : memref<8x1x1xf32, #tpu.memory_space<vmem>>, vector<8x1x1xf32>
    %6 = vector.broadcast %5 : vector<8x1x1xf32> to vector<8x16x16xf32>
    %7 = arith.addf %4, %6 : vector<8x16x16xf32>
    %8 = vector.extract_strided_slice %7 {offsets = [0, 0, 0], sizes = [8, 14, 14], strides = [1, 1, 1]} : vector<8x16x16xf32> to vector<8x14x14xf32>
    %cst = arith.constant 0.000000e+00 : f32
    %cst_9 = arith.constant 6.000000e+00 : f32
    %9 = vector.broadcast %cst : f32 to vector<8x14x14xf32>
    %10 = arith.maximumf %9, %8 : vector<8x14x14xf32>
    %11 = vector.broadcast %cst_9 : f32 to vector<8x14x14xf32>
    %12 = arith.minimumf %11, %10 : vector<8x14x14xf32>
    %c0_10 = arith.constant 0 : index
    %c0_11 = arith.constant 0 : index
    %c0_12 = arith.constant 0 : index
    %c0_13 = arith.constant 0 : index
    %13 = vector.load %arg4[%c0_10, %c0_11, %c0_12, %c0_13] : memref<1x8x14x14xf32, #tpu.memory_space<vmem>>, vector<1x8x14x14xf32>
    %14 = vector.shape_cast %13 : vector<1x8x14x14xf32> to vector<8x14x14xf32>
    %15 = vector.shape_cast %12 : vector<8x14x14xf32> to vector<1x8x14x14xf32>
    tpu.vector_store %arg4[%c0_10, %c0_11, %c0_12, %c0_13], %15 {strides = array<i32>} : memref<1x8x14x14xf32, #tpu.memory_space<vmem>>, vector<1x8x14x14xf32>,
    return
  }
  func.func @transform_0(%arg0: i32) -> (i32, i32, i32) {
    %c0_i32 = arith.constant 0 : i32
    %c0_i32_0 = arith.constant 0 : i32
    %c0_i32_1 = arith.constant 0 : i32
    %c0_i32_2 = arith.constant 0 : i32
    return %c0_i32, %c0_i32_0, %c0_i32_1 : i32, i32, i32
  }
  func.func @transform_1(%arg0: i32) -> (i32, i32, i32) {
    %c0_i32 = arith.constant 0 : i32
    %c0_i32_0 = arith.constant 0 : i32
    %c0_i32_1 = arith.constant 0 : i32
    %c0_i32_2 = arith.constant 0 : i32
    return %c0_i32, %c0_i32_0, %c0_i32_1 : i32, i32, i32
  }
  func.func @transform_2(%arg0: i32) -> (i32, i32, i32, i32) {
    %c0_i32 = arith.constant 0 : i32
    %c0_i32_0 = arith.constant 0 : i32
    %c0_i32_1 = arith.constant 0 : i32
    %c0_i32_2 = arith.constant 0 : i32
    return %c0_i32, %arg0, %c0_i32_0, %c0_i32_1 : i32, i32, i32, i32
  }
  func.func @transform_3(%arg0: i32) -> (i32, i32, i32, i32) {
    %c0_i32 = arith.constant 0 : i32
    %c0_i32_0 = arith.constant 0 : i32
    %c0_i32_1 = arith.constant 0 : i32
    %c0_i32_2 = arith.constant 0 : i32
    return %arg0, %c0_i32, %c0_i32_0, %c0_i32_1 : i32, i32, i32, i32
  }
}

</mosaic_0001>

<bundles_post_ra>
// kernel: conv_block_forward.3
= control target key start
LH: loop header
LB: loop body
LE: loop exit
PB: predicated region body
PF: predicated region fallthrough
CT: control target
= control target key end

     0   :  { %s689_s12 = smov 0   ;;  %s691_s13 = smov 0   ;;  %s872_s0 = inlined_call_operand.vmem [shape: f32[8,1,1], index: 0, kind: input, shape index: {}]   ;;  %s873_s1 = inlined_call_operand.vmem [shape: f32[8,1,1], index: 1, kind: input, shape index: {}]   ;;  %s874_s2 = inlined_call_operand.vmem [shape: f32[8,2,16,16], index: 2, kind: input, shape index: {}]   ;;  %s875_s3 = inlined_call_operand.vmem [shape: f32[2,8,14,14], index: 3, kind: output, shape index: {}]  }
   0x1   :  { %s693_s14 = smov 0  }
   0x2 LB: > { %s586_s15 = sadd.s32 4294967295, %s666_s14   ;;  %s706_s16 = sadd.s32 1, %s666_s14   ;;  %s666_s14 = sphi %s693_s14, %s878_s14   ;;  %s662_s13 = sphi %s691_s13, %s877_s13   ;;  %s658_s12 = sphi %s689_s12, %s876_s12  }
   0x3   : > { %s59_s17 = ssub.s32 %s666_s14, %s706_s16  ;;  %s62_s18 = sadd.s32 1, %s662_s13 }
   0x4   : > { %p60_p0 = scmp.eq.s32.totalorder %s59_s17, 0  ;;  %p69_p1 = scmp.ne.s32.totalorder %s662_s13, %s658_s12 }
   0x5   : > { %p70_p2 = scmp.eq.s32.totalorder %s666_s14, 0  ;;  %p589_p4 = scmp.ge.s32.totalorder %s666_s14, 2 }
   0x6   : > { %s715_s19 = scalar_select %p60_p0, %s662_s13, %s62_s18  }
   0x7   : > { %p71_p3 = por %p70_p2, %p69_p1  ;;  %127 = sbr.rel (%p589_p4) target bundleno = 24 (0x18), region = 24 }
   0xc   : > { %130 = sbr.rel (!%p71_p3) target bundleno = 24 (0x18), region = 28  ;;  %s132_s20 = sand.u32 (%p71_p3), 1, %s662_s13  }
   0xd   : > { %s615_s21 = sshll.u32 (%p71_p3), %s666_s14, 4  ;;  %s590_s22 = sshll.u32 (%p71_p3), %s132_s20, 7 }
   0xe   : > { %s723_s25 = scalar_lea.vmem (%p71_p3), %s874_s2, %s615_s21  ;;  %s134_s26 = scalar_lea.vmem (%p71_p3), [#allocation2], %s590_s22 }
   0xf   : > { %v196_v0 = vld [vmem:[%s723_s25] sm:$0xff] (%p71_p3)  ;;  %v198_v1 = vld [vmem:[%s723_s25 + $0x8] sm:$0xff] (%p71_p3) }
  0x10   : > { %v200_v2 = vld [vmem:[%s723_s25 + $0x20] sm:$0xff] (%p71_p3)  ;;  %197 = vst [vmem:[%s134_s26] sm:$0xff] (%p71_p3), %v196_v0  ;;  %199 = vst [vmem:[%s134_s26 + $0x8] sm:$0xff] (%p71_p3), %v198_v1  ;;  %v202_v3 = vld [vmem:[%s723_s25 + $0x28] sm:$0xff] (%p71_p3) }
  0x11   : > { %201 = vst [vmem:[%s134_s26 + $0x10] sm:$0xff] %v200_v2  ;;  %v204_v4 = vld [vmem:[%s723_s25 + $0x40] sm:$0xff]  ;;  %v206_v5 = vld [vmem:[%s723_s25 + $0x48] sm:$0xff]  ;;  %203 = vst [vmem:[%s134_s26 + $0x18] sm:$0xff] %v202_v3 }
  0x12   : > { %205 = vst [vmem:[%s134_s26 + $0x20] sm:$0xff] %v204_v4  ;;  %207 = vst [vmem:[%s134_s26 + $0x28] sm:$0xff] %v206_v5  ;;  %v208_v6 = vld [vmem:[%s723_s25 + $0x60] sm:$0xff]  ;;  %v210_v7 = vld [vmem:[%s723_s25 + $0x68] sm:$0xff] }
  0x13   : > { %v212_v8 = vld [vmem:[%s723_s25 + $0x80] sm:$0xff]  ;;  %209 = vst [vmem:[%s134_s26 + $0x30] sm:$0xff] %v208_v6  ;;  %211 = vst [vmem:[%s134_s26 + $0x38] sm:$0xff] %v210_v7  ;;  %v214_v9 = vld [vmem:[%s723_s25 + $0x88] sm:$0xff] }
  0x14   : > { %213 = vst [vmem:[%s134_s26 + $0x40] sm:$0xff] %v212_v8  ;;  %v216_v10 = vld [vmem:[%s723_s25 + $0xa0] sm:$0xff]  ;;  %v218_v11 = vld [vmem:[%s723_s25 + $0xa8] sm:$0xff]  ;;  %215 = vst [vmem:[%s134_s26 + $0x48] sm:$0xff] %v214_v9 }
  0x15   : > { %217 = vst [vmem:[%s134_s26 + $0x50] sm:$0xff] %v216_v10  ;;  %219 = vst [vmem:[%s134_s26 + $0x58] sm:$0xff] %v218_v11  ;;  %v220_v12 = vld [vmem:[%s723_s25 + $0xc0] sm:$0xff]  ;;  %v222_v13 = vld [vmem:[%s723_s25 + $0xc8] sm:$0xff] }
  0x16   : > { %v224_v14 = vld [vmem:[%s723_s25 + $0xe0] sm:$0xff]  ;;  %221 = vst [vmem:[%s134_s26 + $0x60] sm:$0xff] %v220_v12  ;;  %223 = vst [vmem:[%s134_s26 + $0x68] sm:$0xff] %v222_v13  ;;  %v226_v15 = vld [vmem:[%s723_s25 + $0xe8] sm:$0xff] }
  0x17   : > { %225 = vst [vmem:[%s134_s26 + $0x70] sm:$0xff] %v224_v14  ;;  %227 = vst [vmem:[%s134_s26 + $0x78] sm:$0xff] %v226_v15 }
  0x18 PF: > { %p593_p5 = scmp.ge.s32.totalorder %s666_s14, 1  ;;  %p232_p6 = scmp.lt.s32.totalorder %s666_s14, 3 }
  0x1a   : > { %p233_p7 = pnand %p593_p5, %p232_p6 }
  0x1b   : > { %s239_s11 = sand.u32 (!%p233_p7), 1, %s658_s12   ;;  %p262_p8 = scmp.lt.s32.totalorder (!%p233_p7), %s586_s15, 1 }
  0x1c   : > { %236 = sbr.rel (%p233_p7) target bundleno = 196 (0xc4), region = 66  ;;  %s594_s17 = sshll.u32 (!%p233_p7), %s239_s11, 7 }
  0x1d   : > { %s794_s18 = scalar_lea.vmem (!%p233_p7), [#allocation2], %s594_s17 }
  0x21   : > { %v599_v16 = vld [vmem:[%s872_s0 + $0x2] ss:$0 sm:$0xff]  ;;  %v597_v17 = vld [vmem:[%s872_s0] ss:$0 sm:$0xff]  ;;  %v668_v18 = vmov 0   ;;  %v268_v40 = vld [vmem:[%s794_s18 + $0x8] sm:$0xff] }
  0x22   : > { %643 = vset.pattern.permute.xlu1 %v668_v18  ;;  %642 = vset.pattern.permute.xlu0 %v668_v18  ;;  %v600_v19 = vld [vmem:[%s872_s0 + $0x3] ss:$0 sm:$0xff]  ;;  %v598_v20 = vld [vmem:[%s872_s0 + $0x1] ss:$0 sm:$0xff]  ;;  %v602_v21 = vld [vmem:[%s872_s0 + $0x5] ss:$0 sm:$0xff] }
  0x23   : > { %340 = vperm.xlu1 %643, %v599_v16   ;;  %332 = vperm.xlu0 %642, %v597_v17   ;;  %v601_v22 = vld [vmem:[%s872_s0 + $0x4] ss:$0 sm:$0xff]  ;;  %v604_v23 = vld [vmem:[%s872_s0 + $0x7] ss:$0 sm:$0xff]  ;;  %v603_v24 = vld [vmem:[%s872_s0 + $0x6] ss:$0 sm:$0xff] }
  0x24   : > { %v606_v25 = vld [vmem:[%s873_s1 + $0x1] ss:$0 sm:$0xff]  ;;  %v605_v26 = vld [vmem:[%s873_s1] ss:$0 sm:$0xff]  ;;  %v608_v27 = vld [vmem:[%s873_s1 + $0x3] ss:$0 sm:$0xff] }
  0x25   : > { %v607_v28 = vld [vmem:[%s873_s1 + $0x2] ss:$0 sm:$0xff]  ;;  %v610_v29 = vld [vmem:[%s873_s1 + $0x5] ss:$0 sm:$0xff]  ;;  %v609_v30 = vld [vmem:[%s873_s1 + $0x4] ss:$0 sm:$0xff] }
  0x26   : > { %v612_v31 = vld [vmem:[%s873_s1 + $0x7] ss:$0 sm:$0xff]  ;;  %v611_v32 = vld [vmem:[%s873_s1 + $0x6] ss:$0 sm:$0xff]  ;;  %v269_v41 = vld [vmem:[%s794_s18 + $0x10] sm:$0xff]  ;;  %s880_s15 = smov (!%p262_p8, %s586_s15), 1 }
  0x27   : > { %344 = vperm.xlu1 %643, %v600_v19   ;;  %336 = vperm.xlu0 %642, %v598_v20   ;;  %v267_v39 = vld [vmem:[%s794_s18] sm:$0xff]  ;;  %v270_v42 = vld [vmem:[%s794_s18 + $0x18] sm:$0xff]  ;;  %v272_v52 = vld [vmem:[%s794_s18 + $0x28] sm:$0xff]  ;;  %s616_s12 = sshll.u32 %s880_s15, 7  ;;  %vm507_vm0 = vcmask 113664   ;;  %vm509_vm1 = vcmask 111616  }
  0x28   : > { %v271_v49 = vld [vmem:[%s794_s18 + $0x20] sm:$0xff]  ;;  %v273_v53 = vld [vmem:[%s794_s18 + $0x30] sm:$0xff]  ;;  %v274_v54 = vld [vmem:[%s794_s18 + $0x38] sm:$0xff]  ;;  %s820_s20 = scalar_lea.vmem %s875_s3, %s616_s12 }
  0x29   : > { %v277_v59 = vld [vmem:[%s794_s18 + $0x50] sm:$0xff]  ;;  %v278_v4 = vld [vmem:[%s794_s18 + $0x58] sm:$0xff]  ;;  %v275_v5 = vld [vmem:[%s794_s18 + $0x40] sm:$0xff] }
  0x2a   : > { %v276_v6 = vld [vmem:[%s794_s18 + $0x48] sm:$0xff] }
  0x2b   : > { %352 = vperm.xlu1 %643, %v602_v21   ;;  %348 = vperm.xlu0 %642, %v601_v22   ;;  %v281_v21 = vld [vmem:[%s794_s18 + $0x70] sm:$0xff] }
  0x2f   : > { %360 = vperm.xlu1 %643, %v604_v23   ;;  %356 = vperm.xlu0 %642, %v603_v24  }
  0x33   : > { %432 = vperm.xlu1 %643, %v606_v25   ;;  %428 = vperm.xlu0 %642, %v605_v26  }
  0x37   : > { %440 = vperm.xlu1 %643, %v608_v27   ;;  %436 = vperm.xlu0 %642, %v607_v28   ;;  %v282_v28 = vld [vmem:[%s794_s18 + $0x78] sm:$0xff] }
  0x3b   : > { %448 = vperm.xlu1 %643, %v610_v29   ;;  %444 = vperm.xlu0 %642, %v609_v30   ;;  %v279_v29 = vld [vmem:[%s794_s18 + $0x60] sm:$0xff]  ;;  %v280_v30 = vld [vmem:[%s794_s18 + $0x68] sm:$0xff] }
  0x3f   : > { %456 = vperm.xlu1 %643, %v612_v31   ;;  %452 = vperm.xlu0 %642, %v611_v32  }
  0x9e   : > { %v341_v33 = vpop.permute.xlu1 %340  ;;  %v333_v34 = vpop.permute.xlu0 %332 }
  0x9f   : > { %v363_v45 = vmul.f32 %v333_v34, %v267_v39  ;;  %v364_v46 = vmul.f32 %v333_v34, %v268_v40  ;;  %v367_v0 = vmul.f32 %v341_v33, %v271_v49  ;;  %v368_v1 = vmul.f32 %v341_v33, %v272_v52 }
  0xa2   : > { %v345_v35 = vpop.permute.xlu1 %344  ;;  %v337_v36 = vpop.permute.xlu0 %336 }
  0xa3   : > { %v365_v47 = vmul.f32 %v337_v36, %v269_v41  ;;  %v366_v48 = vmul.f32 %v337_v36, %v270_v42  ;;  %v369_v2 = vmul.f32 %v345_v35, %v273_v53  ;;  %v370_v3 = vmul.f32 %v345_v35, %v274_v54 }
  0xa6   : > { %v353_v37 = vpop.permute.xlu1 %352  ;;  %v349_v38 = vpop.permute.xlu0 %348 }
  0xa7   : > { %v373_v17 = vmul.f32 %v353_v37, %v277_v59  ;;  %v374_v18 = vmul.f32 %v353_v37, %v278_v4  ;;  %v371_v19 = vmul.f32 %v349_v38, %v275_v5  ;;  %v372_v20 = vmul.f32 %v349_v38, %v276_v6 }
  0xaa   : > { %v800_v43 = vpop.permute.xlu1 %360  ;;  %v802_v44 = vpop.permute.xlu0 %356 }
  0xae   : > { %v433_v50 = vpop.permute.xlu1 %432  ;;  %v429_v51 = vpop.permute.xlu0 %428 }
  0xaf   : > { %v461_v55 = vadd.f32 %v433_v50, %v365_v47  ;;  %v462_v56 = vadd.f32 %v433_v50, %v366_v48  ;;  %v459_v57 = vadd.f32 %v429_v51, %v363_v45  ;;  %v460_v58 = vadd.f32 %v429_v51, %v364_v46 }
  0xb0   : > { %v377_v45 = vmul.f32 %v800_v43, %v281_v21  ;;  %v378_v46 = vmul.f32 %v800_v43, %v282_v28  ;;  %v375_v47 = vmul.f32 %v802_v44, %v279_v29  ;;  %v376_v48 = vmul.f32 %v802_v44, %v280_v30 }
  0xb1   : > { %v477_v60 = vmax.f32 %v461_v55, 0.0  ;;  %v478_v61 = vmax.f32 %v462_v56, 0.0  ;;  %v475_v62 = vmax.f32 %v459_v57, 0.0  ;;  %v476_v63 = vmax.f32 %v460_v58, 0.0 }
  0xb2   : > { %v441_v7 = vpop.permute.xlu1 %440  ;;  %v437_v8 = vpop.permute.xlu0 %436 }
  0xb3   : > { %v493_v9 = vmin.f32 %v477_v60, 6.0  ;;  %v494_v10 = vmin.f32 %v478_v61, 6.0  ;;  %v491_v11 = vmin.f32 %v475_v62, 6.0  ;;  %v492_v12 = vmin.f32 %v476_v63, 6.0 }
  0xb4   : > { %v465_v13 = vadd.f32 %v441_v7, %v369_v2  ;;  %v466_v14 = vadd.f32 %v441_v7, %v370_v3  ;;  %v463_v15 = vadd.f32 %v437_v8, %v367_v0  ;;  %v464_v16 = vadd.f32 %v437_v8, %v368_v1 }
  0xb5   : > { %511 = vst.msk [vmem:[%s820_s20 + $0x10] sm:$0xff] %vm507_vm0, %v493_v9  ;;  %508 = vst.msk [vmem:[%s820_s20] sm:$0xff] %vm507_vm0, %v491_v11 }
  0xb6   : > { %512 = vst.msk [vmem:[%s820_s20 + $0x18] sm:$0x3f] %vm509_vm1, %v494_v10  ;;  %510 = vst.msk [vmem:[%s820_s20 + $0x8] sm:$0x3f] %vm509_vm1, %v492_v12  ;;  %v481_v22 = vmax.f32 %v465_v13, 0.0  ;;  %v482_v23 = vmax.f32 %v466_v14, 0.0  ;;  %v449_v26 = vpop.permute.xlu1 %448  ;;  %v445_v27 = vpop.permute.xlu0 %444 }
  0xb7   : > { %v479_v24 = vmax.f32 %v463_v15, 0.0  ;;  %v480_v25 = vmax.f32 %v464_v16, 0.0  ;;  %v469_v31 = vadd.f32 %v449_v26, %v373_v17  ;;  %v470_v32 = vadd.f32 %v449_v26, %v374_v18 }
  0xb8   : > { %v467_v33 = vadd.f32 %v445_v27, %v371_v19  ;;  %v468_v34 = vadd.f32 %v445_v27, %v372_v20  ;;  %v497_v35 = vmin.f32 %v481_v22, 6.0  ;;  %v498_v36 = vmin.f32 %v482_v23, 6.0 }
  0xb9   : > { %v495_v37 = vmin.f32 %v479_v24, 6.0  ;;  %v496_v38 = vmin.f32 %v480_v25, 6.0  ;;  %v485_v39 = vmax.f32 %v469_v31, 0.0  ;;  %v486_v40 = vmax.f32 %v470_v32, 0.0 }
  0xba   : > { %v483_v41 = vmax.f32 %v467_v33, 0.0  ;;  %v484_v42 = vmax.f32 %v468_v34, 0.0  ;;  %515 = vst.msk [vmem:[%s820_s20 + $0x30] sm:$0xff] %vm507_vm0, %v497_v35  ;;  %v457_v49 = vpop.permute.xlu1 %456  ;;  %v453_v50 = vpop.permute.xlu0 %452 }
  0xbb   : > { %516 = vst.msk [vmem:[%s820_s20 + $0x38] sm:$0x3f] %vm509_vm1, %v498_v36  ;;  %514 = vst.msk [vmem:[%s820_s20 + $0x28] sm:$0x3f] %vm509_vm1, %v496_v38  ;;  %v501_v51 = vmin.f32 %v485_v39, 6.0  ;;  %v502_v43 = vmin.f32 %v486_v40, 6.0  ;;  %v473_v54 = vadd.f32 %v457_v49, %v377_v45  ;;  %v474_v44 = vadd.f32 %v457_v49, %v378_v46 }
  0xbc   : > { %513 = vst.msk [vmem:[%s820_s20 + $0x20] sm:$0xff] %vm507_vm0, %v495_v37  ;;  %v499_v52 = vmin.f32 %v483_v41, 6.0  ;;  %v500_v53 = vmin.f32 %v484_v42, 6.0  ;;  %v471_v55 = vadd.f32 %v453_v50, %v375_v47  ;;  %v472_v56 = vadd.f32 %v453_v50, %v376_v48 }
  0xbd   : > { %519 = vst.msk [vmem:[%s820_s20 + $0x50] sm:$0xff] %vm507_vm0, %v501_v51  ;;  %v489_v57 = vmax.f32 %v473_v54, 0.0  ;;  %v490_v58 = vmax.f32 %v474_v44, 0.0 }
  0xbe   : > { %520 = vst.msk [vmem:[%s820_s20 + $0x58] sm:$0x3f] %vm509_vm1, %v502_v43  ;;  %518 = vst.msk [vmem:[%s820_s20 + $0x48] sm:$0x3f] %vm509_vm1, %v500_v53  ;;  %v487_v59 = vmax.f32 %v471_v55, 0.0  ;;  %v488_v60 = vmax.f32 %v472_v56, 0.0 }
  0xbf   : > { %517 = vst.msk [vmem:[%s820_s20 + $0x40] sm:$0xff] %vm507_vm0, %v499_v52  ;;  %v505_v61 = vmin.f32 %v489_v57, 6.0  ;;  %v506_v62 = vmin.f32 %v490_v58, 6.0 }
  0xc0   : > { %v503_v63 = vmin.f32 %v487_v59, 6.0  ;;  %v504_v0 = vmin.f32 %v488_v60, 6.0 }
  0xc1   : > { %523 = vst.msk [vmem:[%s820_s20 + $0x70] sm:$0xff] %vm507_vm0, %v505_v61 }
  0xc2   : > { %524 = vst.msk [vmem:[%s820_s20 + $0x78] sm:$0x3f] %vm509_vm1, %v506_v62  ;;  %522 = vst.msk [vmem:[%s820_s20 + $0x68] sm:$0x3f] %vm509_vm1, %v504_v0 }
  0xc3   : > { %521 = vst.msk [vmem:[%s820_s20 + $0x60] sm:$0xff] %vm507_vm0, %v503_v63 }
  0xc4 PF: > { %p10_p9 = scmp.ge.s32.totalorder %s706_s16, 4   ;;  %s876_s12 = smov %s662_s13 }
  0xc5   : > { %s877_s13 = smov %s715_s19  ;;  %s878_s14 = smov %s706_s16 }
  0xc6   :  { %12 = sbr.rel (!%p10_p9) target bundleno = 2 (0x2), region = 105 }

// kernel: conv_block_forward.2
= control target key start
LH: loop header
LB: loop body
LE: loop exit
PB: predicated region body
PF: predicated region fallthrough
CT: control target
= control target key end

     0   :  { %s1134_s21 = smov 0   ;;  %s1218_s0 = inlined_call_operand.vmem [shape: bf16[8,36], index: 0, kind: input, shape index: {}]   ;;  %s1219_s1 = inlined_call_operand.vmem [shape: bf16[4,640], index: 1, kind: input, shape index: {}, may-alias: {1,2}]   ;;  %s1220_s2 = inlined_call_operand.vmem [shape: bf16[4,640], index: 2, kind: input, shape index: {}, may-alias: {1,2}]   ;;  %s1221_s3 = inlined_call_operand.vmem [shape: f32[1,512], index: 3, kind: input, shape index: {}]   ;;  %s1222_s4 = inlined_call_operand.vmem [shape: f32[8,512], index: 4, kind: output, shape index: {0}]   ;;  %s1223_s5 = inlined_call_operand.vmem [shape: f32[4,8,1], index: 5, kind: output, shape index: {1}]   ;;  %s1224_s6 = inlined_call_operand.vmem [shape: f32[4,8,1], index: 6, kind: output, shape index: {2}]  }
   0x1 LB: > { %s1140_s22 = sadd.s32 4294967295, %s1081_s21   ;;  %p959_p0 = scmp.ge.s32.totalorder %s1081_s21, 1  ;;  %s1081_s21 = sphi %s1134_s21, %s17_s21  }
   0x2   : > { %p237_p1 = scmp.lt.s32.totalorder %s1081_s21, 5 }
   0x4   : > { %p238_p2 = pnand %p959_p0, %p237_p1 }
   0x5   : > { %p281_p3 = scmp.lt.s32.totalorder (!%p238_p2), %s1140_s22, 4  ;;  %s1085_s26 = smov (!%p238_p2), 124  }
   0x6   : > { %241 = sbr.rel (%p238_p2) target bundleno = 515 (0x203), region = 36  ;;  %s285_s27 = sadd.s32 (!%p238_p2), 1, %s1140_s22 }
   0x7   : > { %p286_p4 = scmp.lt.s32.totalorder (!%p238_p2), %s285_s27, 4  ;;  %s1086_s8 = smov (!%p238_p2), 127  }
   0x8   : > { %s1087_s9 = smov (!%p238_p2), 126   ;;  %s1088_s14 = smov (!%p238_p2), 120  }
   0x9   : > { %s1089_s15 = smov (!%p238_p2), 112   ;;  %s1090_s16 = smov (!%p238_p2), 111  }
   0xa   : > { %s1091_s17 = smov (!%p238_p2), 116   ;;  %s1092_s18 = smov (!%p238_p2), 110  }
   0xb   : > { %v309_v0 = vld [vmem:[%s1218_s0] sm:$0xf]  ;;  %v1083_v2 = vmov 0.0   ;;  %s282_s25 = scalar_select %p281_p3, %s1140_s22, 4  ;;  %vm1084_vm0 = vmmov 0   ;;  %vm327_vm1 = vcmask 1041408  }
   0xc   : > { %v965_v1 = vcombine.low %v309_v0, %v309_v0  ;;  %996 = vmatprep.subr.bf16.mxu0 %v1083_v2  ;;  %1002 = vmatprep.subr.bf16.mxu1 %v1083_v2  ;;  %s1226_s27 = smov (!%p286_p4, %s285_s27), 4  ;;  %vm323_vm2 = vcmask 31744   ;;  %s1093_s19 = smov 96   ;;  %vm321_vm3 = vcmask 1039360   ;;  %vm423_vm4 = vcmask 1031168  }
   0xd   : > { %998 = vmatprep.mubr.msk.bf16.mxu0 %vm1084_vm0, %v1083_v2  ;;  %1004 = vmatprep.mubr.msk.bf16.mxu1 %vm1084_vm0, %v1083_v2  ;;  %s960_s28 = sshll.u32 %s282_s25, 1  ;;  %s961_s10 = sshll.u32 %s1226_s27, 1  ;;  %vm478_vm5 = vcmask 916480   ;;  %vm533_vm6 = vcmask 908288   ;;  %vm588_vm7 = vcmask 900096   ;;  %vm643_vm8 = vcmask 785408  }
   0xe   : > { %313 = vrot.lane.b32.xlu1 %v965_v1, %s1085_s26  ;;  %s284_s7 = scalar_lea.vmem %s1219_s1, %s960_s28  ;;  %s289_s13 = scalar_lea.vmem %s1220_s2, %s961_s10  ;;  %vm698_vm9 = vcmask 777216   ;;  %vm753_vm10 = vcmask 769024   ;;  %vm813_vm11 = vcmask 7168  }
   0xf   : > { %v307_v3 = vld [vmem:[%s284_s7] sm:$0x3]  ;;  %s1094_s20 = smov 104   ;;  %s1095_s23 = smov 108  }
  0x10   : > { %317 = vrot.lane.b32.xlu0 %v307_v3, %s1086_s8  ;;  %v375_v4 = vsel %vm327_vm1, %v307_v3, 0  ;;  %v308_v5 = vld [vmem:[%s289_s13] sm:$0x3]  ;;  %s1096_s24 = smov 95   ;;  %s1097_s25 = smov 94  }
  0x11   : > { %1003 = vmatpush3.bf16.msra.mxu1 %v375_v4  ;;  %s1098_s26 = smov 100   ;;  %p291_p5 = scmp.lt.s32.totalorder %s1140_s22, 3 }
  0x12   : > { %419 = vrot.lane.b32.xlu1 %v307_v3, %s1087_s9  ;;  %1014 = vmatprep.subr.bf16.mxu1 %v1083_v2 }
  0x13   : > { %s1228_s22 = smov (!%p291_p5, %s1140_s22), 3 }
  0x14   : > { %319 = vrot.lane.b32.xlu0 %v308_v5, %s1086_s8  ;;  %1005 = vmatmul.mubr.msk.bf16.vlgmr.msra.gmra.mxu1 %vm323_vm2, %v309_v0  ;;  %s293_s29 = scalar_lea.vmem %s1221_s3, %s1228_s22  ;;  %s962_s30 = sshll.u32 %s1228_s22, 3 }
  0x15   : > { %1016 = vmatprep.mubr.msk.bf16.mxu1 %vm1084_vm0, %v1083_v2  ;;  %s301_s11 = scalar_lea.vmem %s1223_s5, %s962_s30 }
  0x16   : > { %417 = vrot.lane.b32.xlu1 %v965_v1, %s1088_s14  ;;  %s305_s14 = scalar_lea.vmem %s1224_s6, %s962_s30 }
  0x18   : > { %421 = vrot.lane.b32.xlu0 %v308_v5, %s1087_s9  ;;  %s297_s9 = scalar_lea.vmem %s1222_s4, %s962_s30 }
  0x1a   : > { %476 = vrot.lane.b32.xlu1 %v308_v5, %s1089_s15 }
  0x1c   : > { %474 = vrot.lane.b32.xlu0 %v307_v3, %s1089_s15 }
  0x1e   : > { %531 = vrot.lane.b32.xlu1 %v308_v5, %s1090_s16 }
  0x20   : > { %529 = vrot.lane.b32.xlu0 %v307_v3, %s1090_s16 }
  0x22   : > { %527 = vrot.lane.b32.xlu1 %v965_v1, %s1089_s15 }
  0x24   : > { %472 = vrot.lane.b32.xlu0 %v965_v1, %s1091_s17 }
  0x26   : > { %586 = vrot.lane.b32.xlu1 %v308_v5, %s1092_s18 }
  0x28   : > { %584 = vrot.lane.b32.xlu0 %v307_v3, %s1092_s18 }
  0x2a   : > { %641 = vrot.lane.b32.xlu1 %v308_v5, %s1093_s19 }
  0x2c   : > { %639 = vrot.lane.b32.xlu0 %v307_v3, %s1093_s19 }
  0x2e   : > { %637 = vrot.lane.b32.xlu1 %v965_v1, %s1094_s20 }
  0x30   : > { %582 = vrot.lane.b32.xlu0 %v965_v1, %s1095_s23 }
  0x32   : > { %696 = vrot.lane.b32.xlu1 %v308_v5, %s1096_s24 }
  0x34   : > { %694 = vrot.lane.b32.xlu0 %v307_v3, %s1096_s24 }
  0x36   : > { %751 = vrot.lane.b32.xlu1 %v308_v5, %s1097_s25 }
  0x38   : > { %749 = vrot.lane.b32.xlu0 %v307_v3, %s1097_s25 }
  0x3a   : > { %747 = vrot.lane.b32.xlu1 %v965_v1, %s1093_s19 }
  0x3c   : > { %692 = vrot.lane.b32.xlu0 %v965_v1, %s1098_s26 }
  0x80   : > { %v314_v6 = vpop.permute.xlu1 %313 }
  0x82   : > { %v318_v7 = vpop.permute.xlu0 %317 }
  0x84   : > { %v420_v8 = vpop.permute.xlu1 %419 }
  0x86   : > { %v320_v9 = vpop.permute.xlu0 %319 }
  0x87   : > { %v322_v11 = vsel %vm321_vm3, %v318_v7, %v320_v9 }
  0x88   : > { %v418_v10 = vpop.permute.xlu1 %417  ;;  %v329_v12 = vsel %vm327_vm1, %v322_v11, 0 }
  0x89   : > { %997 = vmatpush3.bf16.msra.mxu0 %v329_v12 }
  0x8a   : > { %v422_v13 = vpop.permute.xlu0 %421  ;;  %1008 = vmatprep.subr.bf16.mxu0 %v1083_v2 }
  0x8b   : > { %v424_v15 = vsel %vm423_vm4, %v420_v8, %v422_v13 }
  0x8c   : > { %v477_v14 = vpop.permute.xlu1 %476  ;;  %v429_v16 = vsel %vm327_vm1, %v424_v15, 0  ;;  %999 = vmatmul.mubr.msk.bf16.vlgmr.msra.gmra.mxu0 %vm323_vm2, %v314_v6 }
  0x8d   : > { %1009 = vmatpush3.bf16.msra.mxu0 %v429_v16  ;;  %1010 = vmatprep.mubr.msk.bf16.mxu0 %vm1084_vm0, %v1083_v2 }
  0x8e   : > { %v475_v17 = vpop.permute.xlu0 %474  ;;  %1020 = vmatprep.subr.bf16.mxu0 %v1083_v2 }
  0x8f   : > { %v479_v19 = vsel %vm478_vm5, %v475_v17, %v477_v14 }
  0x90   : > { %v532_v18 = vpop.permute.xlu1 %531  ;;  %v484_v20 = vsel %vm327_vm1, %v479_v19, 0 }
  0x91   : > { %1015 = vmatpush3.bf16.msra.mxu1 %v484_v20  ;;  %v975_v20 = vld [vmem:[%s293_s29] ss:$0 sm:$0xff] }
  0x92   : > { %v530_v21 = vpop.permute.xlu0 %529  ;;  %1026 = vmatprep.subr.bf16.mxu1 %v1083_v2 }
  0x93   : > { %v534_v23 = vsel %vm533_vm6, %v530_v21, %v532_v18 }
  0x94   : > { %v528_v22 = vpop.permute.xlu1 %527  ;;  %v539_v24 = vsel %vm327_vm1, %v534_v23, 0  ;;  %1011 = vmatmul.mubr.msk.bf16.vlgmr.msra.gmra.mxu0 %vm323_vm2, %v418_v10 }
  0x95   : > { %1021 = vmatpush3.bf16.msra.mxu0 %v539_v24  ;;  %1022 = vmatprep.mubr.msk.bf16.mxu0 %vm1084_vm0, %v1083_v2 }
  0x96   : > { %v473_v25 = vpop.permute.xlu0 %472  ;;  %1032 = vmatprep.subr.bf16.mxu0 %v1083_v2 }
  0x97   : > { %1017 = vmatmul.mubr.msk.bf16.vlgmr.msra.gmra.mxu1 %vm323_vm2, %v473_v25 }
  0x98   : > { %v587_v26 = vpop.permute.xlu1 %586  ;;  %1028 = vmatprep.mubr.msk.bf16.mxu1 %vm1084_vm0, %v1083_v2 }
  0x9a   : > { %v585_v27 = vpop.permute.xlu0 %584 }
  0x9b   : > { %v589_v29 = vsel %vm588_vm7, %v585_v27, %v587_v26 }
  0x9c   : > { %v642_v28 = vpop.permute.xlu1 %641  ;;  %v594_v30 = vsel %vm327_vm1, %v589_v29, 0  ;;  %1023 = vmatmul.mubr.msk.bf16.vlgmr.msra.gmra.mxu0 %vm323_vm2, %v528_v22 }
  0x9d   : > { %1027 = vmatpush3.bf16.msra.mxu1 %v594_v30  ;;  %1034 = vmatprep.mubr.msk.bf16.mxu0 %vm1084_vm0, %v1083_v2 }
  0x9e   : > { %v640_v31 = vpop.permute.xlu0 %639  ;;  %1038 = vmatprep.subr.bf16.mxu1 %v1083_v2 }
  0x9f   : > { %v644_v33 = vsel %vm643_vm8, %v640_v31, %v642_v28 }
  0xa0   : > { %v638_v32 = vpop.permute.xlu1 %637  ;;  %v649_v34 = vsel %vm327_vm1, %v644_v33, 0 }
  0xa1   : > { %1033 = vmatpush3.bf16.msra.mxu0 %v649_v34 }
  0xa2   : > { %v583_v35 = vpop.permute.xlu0 %582  ;;  %1044 = vmatprep.subr.bf16.mxu0 %v1083_v2 }
  0xa3   : > { %1029 = vmatmul.mubr.msk.bf16.vlgmr.msra.gmra.mxu1 %vm323_vm2, %v583_v35 }
  0xa4   : > { %v697_v36 = vpop.permute.xlu1 %696  ;;  %1035 = vmatmul.mubr.msk.bf16.vlgmr.msra.gmra.mxu0 %vm323_vm2, %v638_v32  ;;  %1040 = vmatprep.mubr.msk.bf16.mxu1 %vm1084_vm0, %v1083_v2 }
  0xa5   : > { %1046 = vmatprep.mubr.msk.bf16.mxu0 %vm1084_vm0, %v1083_v2 }
  0xa6   : > { %v695_v37 = vpop.permute.xlu0 %694 }
  0xa7   : > { %v699_v38 = vsel %vm698_vm9, %v695_v37, %v697_v36 }
  0xa8   : > { %v752_v39 = vpop.permute.xlu1 %751  ;;  %v704_v40 = vsel %vm327_vm1, %v699_v38, 0 }
  0xa9   : > { %1039 = vmatpush3.bf16.msra.mxu1 %v704_v40 }
  0xaa   : > { %v750_v41 = vpop.permute.xlu0 %749 }
  0xab   : > { %v754_v42 = vsel %vm753_vm10, %v750_v41, %v752_v39 }
  0xac   : > { %v759_v43 = vsel %vm327_vm1, %v754_v42, 0  ;;  %v748_v44 = vpop.permute.xlu1 %747 }
  0xad   : > { %1045 = vmatpush3.bf16.msra.mxu0 %v759_v43 }
  0xae   : > { %v693_v45 = vpop.permute.xlu0 %692 }
  0xaf   : > { %1041 = vmatmul.mubr.msk.bf16.vlgmr.msra.gmra.mxu1 %vm323_vm2, %v693_v45 }
  0xb0   : > { %1047 = vmatmul.mubr.msk.bf16.vlgmr.msra.gmra.mxu0 %vm323_vm2, %v748_v44 }
  0xd4   : > { %v411_v46 = vpop.f32.mrf.mxu1 }
  0xd6   : > { %v1006_v47 = vpop.f32.mrf.mxu1 }
  0xd8   : > { %v414_v48 = vpop.f32.mrf.mxu1 }
  0xda   : > { %v1007_v49 = vpop.f32.mrf.mxu1 }
 0x14c   : > { %v365_v50 = vpop.f32.mrf.mxu0 }
 0x14d   : > { %v412_v0 = vadd.f32 %v411_v46, %v365_v50 }
 0x14e   : > { %v1000_v51 = vpop.f32.mrf.mxu0 }
 0x150   : > { %v368_v52 = vpop.f32.mrf.mxu0 }
 0x152   : > { %v1001_v53 = vpop.f32.mrf.mxu0 }
 0x154   : > { %v465_v54 = vpop.f32.mrf.mxu0 }
 0x155   : > { %v471_v2 = vadd.f32 %v465_v54, %v412_v0 }
 0x156   : > { %v1012_v55 = vpop.f32.mrf.mxu0 }
 0x157   : > { %v520_v56 = vpop.f32.mrf.mxu1 }
 0x158   : > { %v468_v57 = vpop.f32.mrf.mxu0  ;;  %v526_v7 = vadd.f32 %v520_v56, %v471_v2 }
 0x159   : > { %v1018_v58 = vpop.f32.mrf.mxu1 }
 0x15a   : > { %v1013_v59 = vpop.f32.mrf.mxu0 }
 0x15b   : > { %v523_v60 = vpop.f32.mrf.mxu1 }
 0x15c   : > { %v575_v61 = vpop.f32.mrf.mxu0 }
 0x15d   : > { %v1019_v62 = vpop.f32.mrf.mxu1  ;;  %v581_v10 = vadd.f32 %v575_v61, %v526_v7 }
 0x15e   : > { %v1024_v63 = vpop.f32.mrf.mxu0 }
 0x160   : > { %v578_v1 = vpop.f32.mrf.mxu0 }
 0x162   : > { %v1025_v3 = vpop.f32.mrf.mxu0 }
 0x163   : > { %v630_v4 = vpop.f32.mrf.mxu1 }
 0x164   : > { %v685_v5 = vpop.f32.mrf.mxu0  ;;  %v636_v13 = vadd.f32 %v630_v4, %v581_v10 }
 0x165   : > { %v1030_v6 = vpop.f32.mrf.mxu1 }
 0x166   : > { %v1036_v8 = vpop.f32.mrf.mxu0  ;;  %v691_v15 = vadd.f32 %v685_v5, %v636_v13 }
 0x167   : > { %v633_v9 = vpop.f32.mrf.mxu1 }
 0x168   : > { %v688_v11 = vpop.f32.mrf.mxu0 }
 0x169   : > { %v1031_v12 = vpop.f32.mrf.mxu1 }
 0x16a   : > { %v1037_v14 = vpop.f32.mrf.mxu0 }
 0x16f   : > { %v740_v16 = vpop.f32.mrf.mxu1 }
 0x170   : > { %v746_v17 = vadd.f32 %v740_v16, %v691_v15  ;;  %v795_v18 = vpop.f32.mrf.mxu0 }
 0x171   : > { %v1042_v19 = vpop.f32.mrf.mxu1 }
 0x172   : > { %v801_v21 = vadd.f32 %v795_v18, %v746_v17  ;;  %v1048_v22 = vpop.f32.mrf.mxu0 }
 0x173   : > { %v743_v23 = vpop.f32.mrf.mxu1 }
 0x174   : > { %v798_v24 = vpop.f32.mrf.mxu0  ;;  %v810_v25 = vmul.f32 %v975_v20, %v801_v21  ;;  %802 = vst [vmem:[%s297_s9] sm:$0xff] %v801_v21 }
 0x175   : > { %v1043_v26 = vpop.f32.mrf.mxu1 }
 0x176   : > { %v1049_v27 = vpop.f32.mrf.mxu0  ;;  %811 = vadd.xlane.f32.xlu0 %v810_v25  ;;  %v815_v28 = vmul.f32 %v810_v25, %v801_v21 }
 0x178   : > { %816 = vadd.xlane.f32.xlu1 %v815_v28 }
 0x1ff   : > { %v812_v29 = vpop.xlane.xlu0 %811 }
 0x200   : > { %814 = vst.msk [vmem:[%s301_s11] sm:$0xff] %vm813_vm11, %v812_v29 }
 0x201   : > { %v817_v30 = vpop.xlane.xlu1 %816 }
 0x202   : > { %818 = vst.msk [vmem:[%s305_s14] sm:$0xff] %vm813_vm11, %v817_v30 }
 0x203 PF: > { %s17_s21 = sadd.s32 1, %s1081_s21  }
 0x204   : > { %p14_p6 = scmp.ge.s32.totalorder %s17_s21, 6  }
 0x206   :  { %16 = sbr.rel (!%p14_p6) target bundleno = 1 (0x1), region = 96 }

</bundles_post_ra>
